<compile_context>
chip_gen: v7x
topology: tpu7x:2x2x1
jax: 0.10.0
libtpu: 0.0.40
codegen_flags: <defaults>
</compile_context>

<pallas_src>
import jax
import jax.numpy as jnp
from jax.experimental import pallas as pl
from jax.experimental.pallas import tpu as pltpu


def _round_up(n, m):
    return ((n + m - 1) // m) * m


# ----------------------------------------------------------------------------
# Pallas kernel: fused linear (in-kernel bf16 cast + matmul + f32 bias).
# Whole-array VMEM refs, single invocation (no grid).
# ----------------------------------------------------------------------------
def _linear_kernel(x_ref, w_ref, b_ref, o_ref):
    x_bf16 = x_ref[...].astype(jnp.bfloat16)                  # VPU cast, in-VMEM
    acc = jnp.dot(x_bf16, w_ref[...],
                  preferred_element_type=jnp.float32)          # MXU, f32 acc
    o_ref[...] = acc + b_ref[...]                              # f32 epilogue


def _fused_linear(x, w_pad, b_pad):
    """y_pad = cast_bf16(x) @ w_pad + b_pad, lane-dense (B, N_pad) f32."""
    B = x.shape[0]
    n_pad = w_pad.shape[1]
    return pl.pallas_call(
        _linear_kernel,
        out_shape=jax.ShapeDtypeStruct((B, n_pad), jnp.float32),
        in_specs=[
            pl.BlockSpec(memory_space=pltpu.MemorySpace.VMEM),
            pl.BlockSpec(memory_space=pltpu.MemorySpace.VMEM),
            pl.BlockSpec(memory_space=pltpu.MemorySpace.VMEM),
        ],
        out_specs=pl.BlockSpec(memory_space=pltpu.MemorySpace.VMEM),
    )(x, w_pad, b_pad)


# ----------------------------------------------------------------------------
# All per-modality Linear heads fused into ONE Pallas matmul.
# Each head's W^T (D_in, D_out) is zero-padded to 128 lanes and concatenated
# along N; one call serves every head (N = H*128 >= 256 for H >= 2).
# ----------------------------------------------------------------------------
class PallasLinearHeads:
    def __init__(self, in_features, out_features_per_head, key):
        self.in_features = in_features
        self.out_features_per_head = tuple(out_features_per_head)

        head_pads = [_round_up(d, 128) for d in self.out_features_per_head]
        n_total = sum(head_pads)

        w_pad = jnp.zeros((in_features, n_total), jnp.bfloat16)
        b_pad = jnp.zeros((1, n_total), jnp.float32)

        slices = []
        off = 0
        for d_out, d_pad in zip(self.out_features_per_head, head_pads):
            key, k_w, k_b = jax.random.split(key, 3)
            bound = 1.0 / (in_features ** 0.5)        # mirrors torch.nn.Linear init
            w = jax.random.uniform(k_w, (d_out, in_features), jnp.float32,
                                   -bound, bound)
            b = jax.random.uniform(k_b, (d_out,), jnp.float32, -bound, bound)
            w_pad = w_pad.at[:, off:off + d_out].set(
                jnp.transpose(w).astype(jnp.bfloat16))
            b_pad = b_pad.at[:, off:off + d_out].set(b.reshape(1, d_out))
            slices.append((off, d_out))
            off += d_pad

        self.w_pad = w_pad           # (D_in, N_pad) bf16, pad cols exactly 0
        self.b_pad = b_pad           # (1,   N_pad) f32,  pad cols exactly 0
        self._slices = tuple(slices)

        head_slices = self._slices

        # Jit the WHOLE forward path (kernel launch + static per-head slices)
        # so the plumbing fuses with the pallas_call instead of dispatching as
        # separate eager XLA ops.
        def forward(x, w_pad, b_pad):
            y_pad = _fused_linear(x, w_pad, b_pad)
            return tuple(y_pad[:, o:o + d] for (o, d) in head_slices)

        self._forward = jax.jit(forward)

    def __call__(self, x):
        outs = self._forward(x, self.w_pad, self.b_pad)
        return outs if len(outs) > 1 else outs[0]


# ----------------------------------------------------------------------------
# IgnoreTrainingArg — exact forward semantics of the PyTorch module:
# drop a `training=` kwarg, delegate everything else to the wrapped module.
# ----------------------------------------------------------------------------
class IgnoreTrainingArg:
    def __init__(self, module):
        self.module = module

    def __call__(self, *args, **kwargs):
        if "training" in kwargs:
            del kwargs["training"]
        return self.module(*args, **kwargs)


if __name__ == "__main__":
    key = jax.random.PRNGKey(0)
    k_x, k_m = jax.random.split(key)

    # Two per-modality heads (H=2 -> fused N_pad = 256, matching the
    # 256-wide MXU lane dimension on v6e/v7x; still fine on v5e's 128).
    B, D_in, D_out = 2, 32, 16
    heads = (D_out, D_out)

    x = jax.random.normal(k_x, (B, D_in), dtype=jnp.float32)

    inner = PallasLinearHeads(D_in, heads, k_m)
    model = IgnoreTrainingArg(inner)

    # `training=True` is silently stripped by the wrapper, just like PyTorch.
    outs = model(x, training=True)
    outs = jax.block_until_ready(outs)

    assert isinstance(outs, tuple) and len(outs) == len(heads)

    # Reference on the same dtype path (bf16 operands, f32 accumulate + bias),
    # using the exact per-head weight/bias slabs the kernel consumed.
    x_bf16 = x.astype(jnp.bfloat16)
    off = 0
    for h, y in enumerate(outs):
        d_out = heads[h]
        w_h = inner.w_pad[:, off:off + d_out]
        b_h = inner.b_pad[:, off:off + d_out]
        y_ref = jnp.dot(x_bf16, w_h, preferred_element_type=jnp.float32) + b_h
        assert y.shape == (B, d_out)
        assert jnp.allclose(y, y_ref, atol=1e-4, rtol=1e-4)
        off += _round_up(d_out, 128)

    print("KERNEL_OK")
</pallas_src>

<mosaic_0001>
module attributes {stable_mosaic.version = 11 : i64} {
  func.func @_linear_kernel(%arg0: memref<2x32xf32, #tpu.memory_space<vmem>>, %arg1: memref<32x256xbf16, #tpu.memory_space<vmem>>, %arg2: memref<1x256xf32, #tpu.memory_space<vmem>>, %arg3: memref<2x256xf32, #tpu.memory_space<vmem>>) attributes {dimension_semantics = [], scalar_prefetch = 0 : i64, scratch_operands = 0 : i64, tpu.core_type = #tpu.core_type<tc>} {
    %c0 = arith.constant 0 : index
    %c0_0 = arith.constant 0 : index
    %0 = vector.load %arg0[%c0, %c0_0] : memref<2x32xf32, #tpu.memory_space<vmem>>, vector<2x32xf32>
    %1 = arith.truncf %0 : vector<2x32xf32> to vector<2x32xbf16>
    %c0_1 = arith.constant 0 : index
    %c0_2 = arith.constant 0 : index
    %2 = vector.load %arg1[%c0_1, %c0_2] : memref<32x256xbf16, #tpu.memory_space<vmem>>, vector<32x256xbf16>
    %cst = arith.constant dense<0.000000e+00> : vector<2x256xf32>
    %3 = tpu.matmul %1, %2, %cst {dimension_numbers = #tpu.dot_dimension_numbers<[1], [0], [0], [1], [0, 0, 1, 1], [], []>} : vector<2x32xbf16>, vector<32x256xbf16>, vector<2x256xf32> -> vector<2x256xf32>
    %c0_3 = arith.constant 0 : index
    %c0_4 = arith.constant 0 : index
    %4 = vector.load %arg2[%c0_3, %c0_4] : memref<1x256xf32, #tpu.memory_space<vmem>>, vector<1x256xf32>
    %5 = vector.broadcast %4 : vector<1x256xf32> to vector<2x256xf32>
    %6 = arith.addf %3, %5 : vector<2x256xf32>
    %c0_5 = arith.constant 0 : index
    %c0_6 = arith.constant 0 : index
    %7 = vector.load %arg3[%c0_5, %c0_6] : memref<2x256xf32, #tpu.memory_space<vmem>>, vector<2x256xf32>
    tpu.vector_store %arg3[%c0_5, %c0_6], %6 {strides = array<i32>} : memref<2x256xf32, #tpu.memory_space<vmem>>, vector<2x256xf32>,
    return
  }
}

</mosaic_0001>

<bundles_post_ra>
// kernel: forward.1
= control target key start
LH: loop header
LB: loop body
LE: loop exit
PB: predicated region body
PF: predicated region fallthrough
CT: control target
= control target key end

     0   :  { %8 = vsyncpa [#allocation3], 0  ;;  %s269_s0 = inlined_call_operand.hbm [shape: f32[2,32], index: 0, kind: input, shape index: {}]   ;;  %s270_s1 = inlined_call_operand.hbm [shape: bf16[32,256], index: 1, kind: input, shape index: {}]   ;;  %s271_s2 = inlined_call_operand.vmem [shape: f32[1,256], index: 2, kind: input, shape index: {}]   ;;  %s272_s3 = inlined_call_operand.vmem [shape: f32[2,256], index: 3, kind: output, shape index: {}]  }
   0x1   :  { %9 = vsyncpa [#allocation5], 0  ;;  %s207_s12 = smov [#allocation2]   ;;  %s208_s14 = smov [#allocation4]  }
   0x2   :  { %s16_s13 = sshll.u32 %s207_s12, 4  ;;  %s25_s15 = sshll.u32 %s208_s14, 4  ;;  %s17_s13 = int_to_ptr.vmem [resolvable:$true] %s16_s13  ;;  %s232_s15 = int_to_ptr.vmem [resolvable:$true] %s25_s15 }
   0x3   :  { %s159_s18 = scalar_lea.hbm %s269_s0, 32 }
   0x4   :  { %p160_p0 = scmp.ne.s32.totalorder %s269_s0, %s159_s18  ;;  %p163_p1 = scmp.lt.u32.totalorder %s159_s18, %s269_s0 }
   0x6   :  { %p165_p2 = pnand %p163_p1, %p160_p0 }
   0x8   :  { %168 = shalt.err (!%p165_p2)
}
   0x9   :  { %s169_s23 = scalar_lea.vmem %s17_s13, 32  ;;  %p174_p4 = scmp.lt.s32.totalorder %s17_s13, %s17_s13 }
   0xa   :  { %p170_p3 = scmp.ne.s32.totalorder %s17_s13, %s169_s23  ;;  %p175_p5 = scmp.lt.s32.totalorder %s169_s23, %s169_s23 }
   0xc   :  { %p176_p6 = por %p175_p5, %p174_p4 }
   0xe   :  { %p177_p7 = pnand %p176_p6, %p170_p3 }
  0x10   :  { %180 = shalt.err (!%p177_p7)
}
  0x11   :  { %19 = dma.hbm_to_vmem [thread:$0]  %s269_s0, 32, %s17_s13, [#allocation3]  }
  0x12   :  { %s181_s28 = scalar_lea.hbm %s270_s1, 512 }
  0x13   :  { %p182_p8 = scmp.ne.s32.totalorder %s270_s1, %s181_s28  ;;  %p185_p9 = scmp.lt.u32.totalorder %s181_s28, %s270_s1 }
  0x15   :  { %p187_p10 = pnand %p185_p9, %p182_p8 }
  0x17   :  { %190 = shalt.err (!%p187_p10)
}
  0x18   :  { %s191_s6 = scalar_lea.vmem %s232_s15, 512  ;;  %p196_p12 = scmp.lt.s32.totalorder %s232_s15, %s232_s15 }
  0x19   :  { %p192_p11 = scmp.ne.s32.totalorder %s232_s15, %s191_s6  ;;  %p197_p13 = scmp.lt.s32.totalorder %s191_s6, %s191_s6 }
  0x1b   :  { %p198_p0 = por %p197_p13, %p196_p12 }
  0x1d   :  { %p199_p1 = pnand %p198_p0, %p192_p11 }
  0x1f   :  { %202 = shalt.err (!%p199_p1)
}
  0x20   :  { %s209_s0 = smov 128   ;;  %s210_s7 = smov 8  }
  0x21   :  { %31 = dma.hbm_to_vmem [thread:$0]  %s270_s1, 512, %s232_s15, [#allocation5], %s209_s0, %s209_s0, %s210_s7  }
  0x22   :  { %203 = dma.done.wait [#allocation3], 32  }
  0x23   :  { %204 = vsyncadd [#allocation3], 4294967264 }
  0x24   :  { %205 = dma.done.wait [#allocation5], 512  }
  0x25   :  { %206 = vsyncadd [#allocation5], 4294966784  ;;  %v211_v0 = vmov 0   ;;  %v153_v1 = vld [vmem:[#allocation4 + $0x4] ss:$8 sps:$4 sm:$0xff]   ;;  %vm79_vm0 = vcmask 261120   ;;  %v49_v7 = vlaneseq }
  0x26   :  { %115 = vmatprep.mubr.bf16.mxu0 %v211_v0  ;;  %v155_v2 = vld [vmem:[#allocation4] ss:$8 sps:$4 sm:$0xff]   ;;  %83 = vmatprep.subr.bf16.mxu0 %v153_v1  ;;  %v156_v3 = vld [vmem:[#allocation4 + $0x14] ss:$8 sps:$4 sm:$0xff]   ;;  %v158_v4 = vld [vmem:[#allocation4 + $0x10] ss:$8 sps:$4 sm:$0xff]  }
  0x27   :  { %84 = vmatpush1.bf16.msra.mxu0 %v155_v2  ;;  %v41_v5 = vld [vmem:[#allocation2] sm:$0x3]  ;;  %v50_v8 = vshrl.u32 %v49_v7, 7  ;;  %v47_v10 = vld [vmem:[%s271_s2] sm:$0x3] }
  0x28   :  { %85 = vmatprep.subr.bf16.mxu0 %v156_v3  ;;  %v42_v6 = vpack.c.bf16 %v41_v5, %v41_v5 }
  0x29   :  { %v51_v9 = vsub.s32 0, %v50_v8  ;;  %v55_v11 = vsub.s32 1, %v50_v8 }
  0x2b   :  { %86 = vmatpush1.bf16.msra.mxu0 %v158_v4  ;;  %v52_v12 = vrot.slane %v47_v10, %v51_v9  ;;  %v56_v13 = vrot.slane %v47_v10, %v55_v11 }
  0x2e   :  { %146 = vmatmul.mubr.msk.bf16.vlgmr.msra.gmra.mrb[0].mxu0 %vm79_vm0, %v42_v6 }
 0x101   :  { %v117_v14 = vpop.f32.mrb[0].mxu0 }
 0x102   :  { %v118_v15 = vadd.f32 %v117_v14, %v52_v12  ;;  %v119_v16 = vpop.f32.mrb[1].mxu0 }
 0x103   :  { %v120_v17 = vadd.f32 %v119_v16, %v56_v13  ;;  %v121_v18 = vpop.f32.mrb[2].mxu0 }
 0x104   :  { %v122_v19 = vpop.f32.mrb[3].mxu0 }
 0x105   :  { %v126_v20 = vcombine.low %v118_v15, %v120_v17 }
 0x107   :  { %147 = vst.sshfl [vmem:[%s272_s3] sm:$0x33 pattern:$0x76325410] %v126_v20 }
 0x108   :  { %140 = vsyncpa [#allocation3], 1 }
 0x109   :  { %141 = vsyncpa [#allocation5], 1 }

</bundles_post_ra>
